<compile_context>
chip_gen: v5e
topology: v5e:2x2
jax: 0.10.0
libtpu: 0.0.40
codegen_flags: <defaults>
</compile_context>

<pallas_src>
import jax
import jax.numpy as jnp
from jax.experimental import pallas as pl
from jax.experimental.pallas import tpu as pltpu


def _round_up(x, m):
    return ((x + m - 1) // m) * m


# ----------------------------------------------------------------------------
# Kernel: one (batch_block, timestep) grid point.
#   x_ref   : [1, BB, Kip]  bf16   [1 | word_t | 0-pad]   (b_U folded via ones)
#   h0_ref  : [BB, Hp]      f32    initial hidden (padded), constant over t
#   ww_ref  : [Kip, Hp]     bf16   [b_U ; W^T ; 0]        (VMEM-resident)
#   ut_ref  : [Hp, Hp]      bf16   U^T padded with zeros  (VMEM-resident)
#   vw_ref  : [Hp, Vp]      bf16   V^T padded; row H = 2*b_V (bias fold)
#   out_ref : [1, BB, Vp]   f32    per-step logits (streamed out every step)
#   hT_ref  : [BB, Hp]      f32    final hidden (written only at t == T-1)
#   h_scr   : [BB, Hp]      f32    VMEM scratch carrying the recurrence
# ----------------------------------------------------------------------------
def rnn_seq_kernel(x_ref, h0_ref, ww_ref, ut_ref, vw_ref,
                   out_ref, hT_ref, h_scr):
    t = pl.program_id(1)

    @pl.when(t == 0)
    def _():
        # (Re)initialize the carried hidden state for this batch block.
        h_scr[...] = h0_ref[...]

    x = x_ref[0]                                   # [BB, Kip] bf16, col0 == 1
    h_prev = h_scr[...].astype(ww_ref.dtype)       # bf16 operand for the MXU

    # pre = [1 | word_t] @ [b_U ; W^T]  +  h_{t-1} @ U^T     (f32 accumulation)
    pre = jnp.dot(x, ww_ref[...], preferred_element_type=jnp.float32)
    pre = pre + jnp.dot(h_prev, ut_ref[...], preferred_element_type=jnp.float32)

    # Padded hidden lanes see pre == 0 -> sigmoid == 0.5 exactly.  Lane H is
    # used to fold b_V (vw row H == 2*b_V); lanes > H multiply zero rows of
    # both ut and vw, so they never leak into the recurrence or the output.
    hidden = jax.nn.sigmoid(pre)                   # [BB, Hp] f32
    h_scr[...] = hidden

    out = jnp.dot(hidden.astype(vw_ref.dtype), vw_ref[...],
                  preferred_element_type=jnp.float32)
    out_ref[0] = out.astype(out_ref.dtype)

    @pl.when(t == pl.num_programs(1) - 1)
    def _():
        # Single hidden-state writeback per sequence (saves per-step vst/DMA,
        # most binding on v5e's single vector-store slot).
        hT_ref[...] = hidden.astype(hT_ref.dtype)


# ----------------------------------------------------------------------------
# One-time parameter preparation (transpose / fuse / pad / cast, hoisted out of
# the per-step path).
# ----------------------------------------------------------------------------
def prepare_params(params, weight_dtype=jnp.bfloat16):
    W = jnp.asarray(params["W"])        # [H, I]  (PyTorch nn.Linear layout)
    Uw = jnp.asarray(params["U_w"])     # [H, H]
    Ub = jnp.asarray(params["U_b"])     # [H]
    Vw = jnp.asarray(params["V_w"])     # [V, H]
    Vb = jnp.asarray(params["V_b"])     # [V]
    H, I = W.shape
    V = Vw.shape[0]

    Kip = _round_up(1 + I, 128)         # ones column + word, padded to lanes
    Hp = _round_up(H, 128)
    if Hp == H:
        # Need one spare hidden lane for the b_V fold (sigmoid(0)=0.5 trick).
        # TODO(synk): if H is an exact multiple of 128, a separate bias add
        # would be cheaper than this extra 128-lane block.
        Hp += 128
    Vp = _round_up(V, 128)

    ww = jnp.zeros((Kip, Hp), weight_dtype)
    ww = ww.at[0, :H].set(Ub.astype(weight_dtype))            # b_U (ones col)
    ww = ww.at[1:1 + I, :H].set(W.T.astype(weight_dtype))     # W^T

    ut = jnp.zeros((Hp, Hp), weight_dtype)
    ut = ut.at[:H, :H].set(Uw.T.astype(weight_dtype))         # U^T

    vw = jnp.zeros((Hp, Vp), weight_dtype)
    vw = vw.at[:H, :V].set(Vw.T.astype(weight_dtype))         # V^T
    vw = vw.at[H, :V].set((2.0 * Vb).astype(weight_dtype))    # b_V fold (0.5 lane)

    return {"ww": ww, "ut": ut, "vw": vw, "dims": (I, H, V, Kip, Hp, Vp)}


def _batch_tiling(B):
    """Pick (Bp, BB).  Small B: one multiple-of-8 block.  Large B: 128/256-row
    blocks so the 'parallel' batch axis has >=2 blocks (v7x dual TensorCore)."""
    if B <= 128:
        BB = _round_up(B, 8)
        return BB, BB
    BB = 256 if B >= 512 else 128
    return _round_up(B, BB), BB


# ----------------------------------------------------------------------------
# Fused multi-timestep forward (the whole recurrence in one pallas_call).
#   prev_hidden: [B, H], words: [T, B, I]
#   returns (hidden_T [B, H], logits [T, B, V])
# ----------------------------------------------------------------------------
def rnn_forward(prev_hidden, words, prep):
    I, H, V, Kip, Hp, Vp = prep["dims"]
    T, B, _ = words.shape
    Bp, BB = _batch_tiling(B)
    nB = Bp // BB
    dt = prep["ww"].dtype

    # Build the padded inputs ONCE per sequence (not per step).
    ones = jnp.ones((T, B, 1), dt)
    x = jnp.concatenate([ones, words.astype(dt)], axis=-1)            # [T,B,1+I]
    x = jnp.pad(x, ((0, 0), (0, Bp - B), (0, Kip - (1 + I))))         # [T,Bp,Kip]
    h0 = jnp.pad(prev_hidden.astype(jnp.float32),
                 ((0, Bp - B), (0, Hp - H)))                          # [Bp,Hp]

    logits_p, hT_p = pl.pallas_call(
        rnn_seq_kernel,
        out_shape=(
            jax.ShapeDtypeStruct((T, Bp, Vp), jnp.float32),
            jax.ShapeDtypeStruct((Bp, Hp), jnp.float32),
        ),
        grid_spec=pltpu.PrefetchScalarGridSpec(
            num_scalar_prefetch=0,
            grid=(nB, T),                                   # batch outer, time inner
            in_specs=[
                pl.BlockSpec((1, BB, Kip), lambda b, t: (t, b, 0)),   # word_t
                pl.BlockSpec((BB, Hp), lambda b, t: (b, 0)),          # h0 (const over t)
                pl.BlockSpec((Kip, Hp), lambda b, t: (0, 0)),         # [b_U;W^T] resident
                pl.BlockSpec((Hp, Hp), lambda b, t: (0, 0)),          # U^T resident
                pl.BlockSpec((Hp, Vp), lambda b, t: (0, 0)),          # V^T (+b_V) resident
            ],
            out_specs=[
                pl.BlockSpec((1, BB, Vp), lambda b, t: (t, b, 0)),    # per-step logits
                pl.BlockSpec((BB, Hp), lambda b, t: (b, 0)),          # final hidden
            ],
            scratch_shapes=[pltpu.VMEM((BB, Hp), jnp.float32)],       # carried hidden
        ),
        compiler_params=pltpu.CompilerParams(
            dimension_semantics=("parallel", "arbitrary"),
            vmem_limit_bytes=32 * 1024 * 1024,
        ),
    )(x, h0, prep["ww"], prep["ut"], prep["vw"])

    # Single slice back to logical shapes at the end of the sequence.
    return hT_p[:B, :H], logits_p[:, :B, :V]


def rnn_cell_forward(prev_hidden, word, prep):
    """Single-step forward matching the PyTorch module's forward().  Just the
    T == 1 case of the fused sequence kernel."""
    h, logits = rnn_forward(prev_hidden, word[None], prep)
    return h, logits[0]


# ----------------------------------------------------------------------------
# Pure-JAX references.
# ----------------------------------------------------------------------------
def reference_cell(prev_hidden, word, params):
    pre = word @ params["W"].T + prev_hidden @ params["U_w"].T + params["U_b"]
    hidden = jax.nn.sigmoid(pre)
    return hidden, hidden @ params["V_w"].T + params["V_b"]


def reference_sequence(prev_hidden, words, params):
    h = prev_hidden
    outs = []
    for t in range(words.shape[0]):
        h, o = reference_cell(h, words[t], params)
        outs.append(o)
    return h, jnp.stack(outs, axis=0)


if __name__ == "__main__":
    # Small shapes consistent with the module.
    batch = 8
    input_size = 16
    hidden_size = 32
    vocab_size = 64
    seq_len = 8

    key = jax.random.PRNGKey(0)
    k_words, k_h, k_w, k_uw, k_ub, k_vw, k_vb = jax.random.split(key, 7)

    words = jax.random.normal(k_words, (seq_len, batch, input_size), jnp.float32)
    prev_hidden = jax.random.normal(k_h, (batch, hidden_size), jnp.float32)

    params = {
        "W": jax.random.normal(k_w, (hidden_size, input_size), jnp.float32) * 0.1,
        "U_w": jax.random.normal(k_uw, (hidden_size, hidden_size), jnp.float32) * 0.1,
        "U_b": jax.random.normal(k_ub, (hidden_size,), jnp.float32) * 0.1,
        "V_w": jax.random.normal(k_vw, (vocab_size, hidden_size), jnp.float32) * 0.1,
        "V_b": jax.random.normal(k_vb, (vocab_size,), jnp.float32) * 0.1,
    }

    prep = prepare_params(params)      # one-time: transpose/fuse/pad/cast (bf16)

    # Single cell (module forward semantics).
    h1, out1 = rnn_cell_forward(prev_hidden, words[0], prep)
    # Fused full sequence (one pallas_call, VMEM-carried hidden).
    hT, logits = rnn_forward(prev_hidden, words, prep)
    h1, out1, hT, logits = jax.block_until_ready((h1, out1, hT, logits))

    h1_ref, out1_ref = reference_cell(prev_hidden, words[0], params)
    hT_ref, logits_ref = reference_sequence(prev_hidden, words, params)

    assert h1.shape == h1_ref.shape and out1.shape == out1_ref.shape
    assert hT.shape == hT_ref.shape and logits.shape == logits_ref.shape
    # bf16 MXU operands -> tolerance loosened accordingly (f32 accumulation).
    tol = dict(atol=3e-2, rtol=3e-2)
    assert jnp.allclose(h1, h1_ref, **tol)
    assert jnp.allclose(out1, out1_ref, **tol)
    assert jnp.allclose(hT, hT_ref, **tol)
    assert jnp.allclose(logits, logits_ref, **tol)

    print("KERNEL_OK")
</pallas_src>

<mosaic_0001>
module attributes {stable_mosaic.version = 11 : i64} {
  func.func @rnn_seq_kernel(%arg0: i32, %arg1: i32, %arg2: memref<1x8x128xbf16, #tpu.memory_space<vmem>>, %arg3: memref<8x128xf32, #tpu.memory_space<vmem>>, %arg4: memref<128x128xbf16, #tpu.memory_space<vmem>>, %arg5: memref<128x128xbf16, #tpu.memory_space<vmem>>, %arg6: memref<128x128xbf16, #tpu.memory_space<vmem>>, %arg7: memref<1x8x128xf32, #tpu.memory_space<vmem>>, %arg8: memref<8x128xf32, #tpu.memory_space<vmem>>, %arg9: memref<8x128xf32, #tpu.memory_space<vmem>>) attributes {dimension_semantics = [#tpu.dimension_semantics<parallel>, #tpu.dimension_semantics<arbitrary>], iteration_bounds = array<i64: 1, 1>, scalar_prefetch = 0 : i64, scratch_operands = 1 : i64, tpu.core_type = #tpu.core_type<tc>, window_params = [{transform_indices = @transform_0, window_bounds = array<i64: 1, 8, 128>}, {transform_indices = @transform_1, window_bounds = array<i64: 8, 128>}, {pipeline_mode = #tpu.pipeline_mode<synchronous>, transform_indices = @transform_2, window_bounds = array<i64: 128, 128>}, {pipeline_mode = #tpu.pipeline_mode<synchronous>, transform_indices = @transform_3, window_bounds = array<i64: 128, 128>}, {pipeline_mode = #tpu.pipeline_mode<synchronous>, transform_indices = @transform_4, window_bounds = array<i64: 128, 128>}, {transform_indices = @transform_5, window_bounds = array<i64: 1, 8, 128>}, {transform_indices = @transform_6, window_bounds = array<i64: 8, 128>}]} {
    %c0_i32 = arith.constant 0 : i32
    %0 = arith.cmpi eq, %arg1, %c0_i32 : i32
    %1 = arith.extui %0 : i1 to i32
    %c0_i32_0 = arith.constant 0 : i32
    %2 = arith.cmpi ne, %1, %c0_i32_0 : i32
    scf.if %2 {
      %c0_21 = arith.constant 0 : index
      %c0_22 = arith.constant 0 : index
      %27 = vector.load %arg3[%c0_21, %c0_22] : memref<8x128xf32, #tpu.memory_space<vmem>>, vector<8x128xf32>
      %c0_23 = arith.constant 0 : index
      %c0_24 = arith.constant 0 : index
      %28 = vector.load %arg9[%c0_23, %c0_24] : memref<8x128xf32, #tpu.memory_space<vmem>>, vector<8x128xf32>
      tpu.vector_store %arg9[%c0_23, %c0_24], %27 {strides = array<i32>} : memref<8x128xf32, #tpu.memory_space<vmem>>, vector<8x128xf32>,
    } else {
    }
    %c0 = arith.constant 0 : index
    %c0_1 = arith.constant 0 : index
    %c0_2 = arith.constant 0 : index
    %3 = vector.load %arg2[%c0, %c0_1, %c0_2] : memref<1x8x128xbf16, #tpu.memory_space<vmem>>, vector<1x8x128xbf16>
    %4 = vector.shape_cast %3 : vector<1x8x128xbf16> to vector<8x128xbf16>
    %c0_3 = arith.constant 0 : index
    %c0_4 = arith.constant 0 : index
    %5 = vector.load %arg9[%c0_3, %c0_4] : memref<8x128xf32, #tpu.memory_space<vmem>>, vector<8x128xf32>
    %6 = arith.truncf %5 : vector<8x128xf32> to vector<8x128xbf16>
    %c0_5 = arith.constant 0 : index
    %c0_6 = arith.constant 0 : index
    %7 = vector.load %arg4[%c0_5, %c0_6] : memref<128x128xbf16, #tpu.memory_space<vmem>>, vector<128x128xbf16>
    %cst = arith.constant dense<0.000000e+00> : vector<8x128xf32>
    %8 = tpu.matmul %4, %7, %cst {dimension_numbers = #tpu.dot_dimension_numbers<[1], [0], [0], [1], [0, 0, 1, 1], [], []>} : vector<8x128xbf16>, vector<128x128xbf16>, vector<8x128xf32> -> vector<8x128xf32>
    %c0_7 = arith.constant 0 : index
    %c0_8 = arith.constant 0 : index
    %9 = vector.load %arg5[%c0_7, %c0_8] : memref<128x128xbf16, #tpu.memory_space<vmem>>, vector<128x128xbf16>
    %cst_9 = arith.constant dense<0.000000e+00> : vector<8x128xf32>
    %10 = tpu.matmul %6, %9, %cst_9 {dimension_numbers = #tpu.dot_dimension_numbers<[1], [0], [0], [1], [0, 0, 1, 1], [], []>} : vector<8x128xbf16>, vector<128x128xbf16>, vector<8x128xf32> -> vector<8x128xf32>
    %11 = arith.addf %8, %10 : vector<8x128xf32>
    %12 = arith.negf %11 : vector<8x128xf32>
    %13 = math.exp %12 : vector<8x128xf32>
    %cst_10 = arith.constant 1.000000e+00 : f32
    %14 = vector.broadcast %cst_10 : f32 to vector<8x128xf32>
    %15 = arith.addf %14, %13 : vector<8x128xf32>
    %16 = arith.divf %14, %15 : vector<8x128xf32>
    %c0_11 = arith.constant 0 : index
    %c0_12 = arith.constant 0 : index
    %17 = vector.load %arg9[%c0_11, %c0_12] : memref<8x128xf32, #tpu.memory_space<vmem>>, vector<8x128xf32>
    tpu.vector_store %arg9[%c0_11, %c0_12], %16 {strides = array<i32>} : memref<8x128xf32, #tpu.memory_space<vmem>>, vector<8x128xf32>,
    %18 = arith.truncf %16 : vector<8x128xf32> to vector<8x128xbf16>
    %c0_13 = arith.constant 0 : index
    %c0_14 = arith.constant 0 : index
    %19 = vector.load %arg6[%c0_13, %c0_14] : memref<128x128xbf16, #tpu.memory_space<vmem>>, vector<128x128xbf16>
    %cst_15 = arith.constant dense<0.000000e+00> : vector<8x128xf32>
    %20 = tpu.matmul %18, %19, %cst_15 {dimension_numbers = #tpu.dot_dimension_numbers<[1], [0], [0], [1], [0, 0, 1, 1], [], []>} : vector<8x128xbf16>, vector<128x128xbf16>, vector<8x128xf32> -> vector<8x128xf32>
    %c0_16 = arith.constant 0 : index
    %c0_17 = arith.constant 0 : index
    %c0_18 = arith.constant 0 : index
    %21 = vector.load %arg7[%c0_16, %c0_17, %c0_18] : memref<1x8x128xf32, #tpu.memory_space<vmem>>, vector<1x8x128xf32>
    %22 = vector.shape_cast %21 : vector<1x8x128xf32> to vector<8x128xf32>
    %23 = vector.shape_cast %20 : vector<8x128xf32> to vector<1x8x128xf32>
    tpu.vector_store %arg7[%c0_16, %c0_17, %c0_18], %23 {strides = array<i32>} : memref<1x8x128xf32, #tpu.memory_space<vmem>>, vector<1x8x128xf32>,
    %c0_i32_19 = arith.constant 0 : i32
    %24 = arith.cmpi eq, %arg1, %c0_i32_19 : i32
    %25 = arith.extui %24 : i1 to i32
    %c0_i32_20 = arith.constant 0 : i32
    %26 = arith.cmpi ne, %25, %c0_i32_20 : i32
    scf.if %26 {
      %c0_21 = arith.constant 0 : index
      %c0_22 = arith.constant 0 : index
      %27 = vector.load %arg8[%c0_21, %c0_22] : memref<8x128xf32, #tpu.memory_space<vmem>>, vector<8x128xf32>
      tpu.vector_store %arg8[%c0_21, %c0_22], %16 {strides = array<i32>} : memref<8x128xf32, #tpu.memory_space<vmem>>, vector<8x128xf32>,
    } else {
    }
    return
  }
  func.func @transform_0(%arg0: i32, %arg1: i32) -> (i32, i32, i32) {
    %c0_i32 = arith.constant 0 : i32
    %c0_i32_0 = arith.constant 0 : i32
    return %arg1, %arg0, %c0_i32 : i32, i32, i32
  }
  func.func @transform_1(%arg0: i32, %arg1: i32) -> (i32, i32) {
    %c0_i32 = arith.constant 0 : i32
    %c0_i32_0 = arith.constant 0 : i32
    return %arg0, %c0_i32 : i32, i32
  }
  func.func @transform_2(%arg0: i32, %arg1: i32) -> (i32, i32) {
    %c0_i32 = arith.constant 0 : i32
    %c0_i32_0 = arith.constant 0 : i32
    %c0_i32_1 = arith.constant 0 : i32
    return %c0_i32, %c0_i32_0 : i32, i32
  }
  func.func @transform_3(%arg0: i32, %arg1: i32) -> (i32, i32) {
    %c0_i32 = arith.constant 0 : i32
    %c0_i32_0 = arith.constant 0 : i32
    %c0_i32_1 = arith.constant 0 : i32
    return %c0_i32, %c0_i32_0 : i32, i32
  }
  func.func @transform_4(%arg0: i32, %arg1: i32) -> (i32, i32) {
    %c0_i32 = arith.constant 0 : i32
    %c0_i32_0 = arith.constant 0 : i32
    %c0_i32_1 = arith.constant 0 : i32
    return %c0_i32, %c0_i32_0 : i32, i32
  }
  func.func @transform_5(%arg0: i32, %arg1: i32) -> (i32, i32, i32) {
    %c0_i32 = arith.constant 0 : i32
    %c0_i32_0 = arith.constant 0 : i32
    return %arg1, %arg0, %c0_i32 : i32, i32, i32
  }
  func.func @transform_6(%arg0: i32, %arg1: i32) -> (i32, i32) {
    %c0_i32 = arith.constant 0 : i32
    %c0_i32_0 = arith.constant 0 : i32
    return %arg0, %c0_i32 : i32, i32
  }
}

</mosaic_0001>

<bundles_post_ra>
// kernel: tpu_custom_call.1
= control target key start
LH: loop header
LB: loop body
LE: loop exit
PB: predicated region body
PF: predicated region fallthrough
CT: control target
= control target key end

     0   :  { %12 = vsyncpa [#allocation4], 0  ;;  %s776_s0 = inlined_call_operand.hbm [shape: bf16[1,8,128], index: 0, kind: input, shape index: {}]   ;;  %s777_s1 = inlined_call_operand.hbm [shape: f32[8,128], index: 1, kind: input, shape index: {}]   ;;  %s778_s2 = inlined_call_operand.hbm [shape: bf16[128,128], index: 2, kind: input, shape index: {}]   ;;  %s779_s3 = inlined_call_operand.hbm [shape: bf16[128,128], index: 3, kind: input, shape index: {}]   ;;  %s780_s4 = inlined_call_operand.hbm [shape: bf16[128,128], index: 4, kind: input, shape index: {}]   ;;  %s781_s5 = inlined_call_operand.hbm [shape: f32[1,8,128], index: 5, kind: output, shape index: {0}]   ;;  %s782_s6 = inlined_call_operand.hbm [shape: f32[8,128], index: 6, kind: output, shape index: {1}]  }
   0x1   :  { %13 = vsyncpa [#allocation7], 0 }
   0x2   :  { %14 = vsyncpa [#allocation10], 0 }
   0x3   :  { %15 = vsyncpa [#allocation5], 0  ;;  %s33_s23 = sshll.u32 %s777_s1, 4  ;;  %s34_s23 = int_to_ptr.hbm [resolvable:$true] %s33_s23 }
   0x4   :  { %16 = vsyncpa [#allocation14], 0  ;;  %s711_s24 = smov [#allocation6]   ;;  %s56_s28 = sshll.u32 %s779_s3, 4  ;;  %s57_s28 = int_to_ptr.hbm [resolvable:$true] %s56_s28 }
   0x5   :  { %s35_s25 = sshll.u32 %s711_s24, 4  ;;  %s712_s29 = smov [#allocation9]   ;;  %s36_s25 = int_to_ptr.vmem [resolvable:$true] %s35_s25 }
   0x6   :  { %38 = dma.hbm_to_vmem [thread:$0]  %s34_s23, 128, %s36_s25, [#allocation7]  }
   0x7   :  { %s58_s30 = sshll.u32 %s712_s29, 4  ;;  %s22_s9 = sshll.u32 %s776_s0, 4  ;;  %s59_s30 = int_to_ptr.vmem [resolvable:$true] %s58_s30  ;;  %s23_s9 = int_to_ptr.hbm [resolvable:$true] %s22_s9 }
   0x8   :  { %s713_s1 = smov 64   ;;  %s714_s10 = smov 4  }
   0x9   :  { %64 = dma.hbm_to_vmem [thread:$0]  %s57_s28, 1024, %s59_s30, [#allocation10], %s713_s1, %s713_s1, %s714_s10  }
   0xa   :  { %s43_s13 = sshll.u32 %s778_s2, 4  ;;  %s715_s14 = smov [#allocation3]   ;;  %s44_s13 = int_to_ptr.hbm [resolvable:$true] %s43_s13 }
   0xb   :  { %s24_s15 = sshll.u32 %s715_s14, 4  ;;  %s716_s3 = smov [#allocation8]   ;;  %s25_s15 = int_to_ptr.vmem [resolvable:$true] %s24_s15 }
   0xc   :  { %27 = dma.hbm_to_vmem [thread:$0]  %s23_s9, 64, %s25_s15, [#allocation4]  }
   0xd   :  { %s45_s16 = sshll.u32 %s716_s3, 4  ;;  %s69_s0 = sshll.u32 %s780_s4, 4  ;;  %s46_s16 = int_to_ptr.vmem [resolvable:$true] %s45_s16  ;;  %s70_s0 = int_to_ptr.hbm [resolvable:$true] %s69_s0 }
   0xe   :  { %51 = dma.hbm_to_vmem [thread:$0]  %s44_s13, 1024, %s46_s16, [#allocation7], %s713_s1, %s713_s1, %s714_s10  }
   0xf   :  { %s717_s19 = smov [#allocation11]  }
  0x10   :  { %s71_s20 = sshll.u32 %s717_s19, 4  ;;  %s72_s20 = int_to_ptr.vmem [resolvable:$true] %s71_s20 }
  0x11   :  { %77 = dma.hbm_to_vmem [thread:$0]  %s70_s0, 1024, %s72_s20, [#allocation10], %s713_s1, %s713_s1, %s714_s10  }
  0x12   :  { %701 = dma.done.wait [#allocation4], 64  }
  0x13   :  { %702 = vsyncadd [#allocation4], 4294967232 }
  0x14   :  { %703 = dma.done.wait [#allocation7], 1152  }
  0x15   :  { %704 = vsyncadd [#allocation7], 4294966144 }
  0x16   :  { %705 = dma.done.wait [#allocation10], 2048  }
  0x17   :  { %706 = vsyncadd [#allocation10], 4294965248  ;;  %v511_v0 = vld [vmem:[#allocation9 + $0x38] sm:$0xff]  ;;  %v510_v2 = vld [vmem:[#allocation9 + $0x30] sm:$0xff]  ;;  %s718_s2 = smov [#allocation13]   ;;  %s382_s23 = sshll.u32 %s782_s6, 4  ;;  %s383_s23 = int_to_ptr.hbm [resolvable:$true] %s382_s23 }
  0x18   :  { %v503_v1 = vld [vmem:[#allocation8 + $0x38] sm:$0xff]  ;;  %187 = vmatpush.bf16.msra.mxu0 %v511_v0  ;;  %v502_v3 = vld [vmem:[#allocation8 + $0x30] sm:$0xff]  ;;  %v509_v4 = vld [vmem:[#allocation9 + $0x28] sm:$0xff]  ;;  %s380_s4 = sshll.u32 %s718_s2, 4  ;;  %s719_s24 = smov [#allocation12]   ;;  %s381_s4 = int_to_ptr.vmem [resolvable:$true] %s380_s4 }
  0x19   :  { %248 = vmatpush.bf16.msra.mxu1 %v503_v1  ;;  %v501_v5 = vld [vmem:[#allocation8 + $0x28] sm:$0xff]  ;;  %v508_v6 = vld [vmem:[#allocation9 + $0x20] sm:$0xff]  ;;  %v507_v8 = vld [vmem:[#allocation9 + $0x18] sm:$0xff]  ;;  %s369_s25 = sshll.u32 %s719_s24, 4  ;;  %s371_s28 = sshll.u32 %s781_s5, 4  ;;  %s370_s25 = int_to_ptr.vmem [resolvable:$true] %s369_s25  ;;  %s372_s28 = int_to_ptr.hbm [resolvable:$true] %s371_s28 }
  0x1a   :  { %v500_v7 = vld [vmem:[#allocation8 + $0x20] sm:$0xff]  ;;  %v499_v9 = vld [vmem:[#allocation8 + $0x18] sm:$0xff]  ;;  %v506_v10 = vld [vmem:[#allocation9 + $0x10] sm:$0xff] }
  0x1b   :  { %v498_v11 = vld [vmem:[#allocation8 + $0x10] sm:$0xff]  ;;  %v505_v12 = vld [vmem:[#allocation9 + $0x8] sm:$0xff]  ;;  %v504_v14 = vld [vmem:[#allocation9] sm:$0xff] }
  0x1c   :  { %188 = vmatpush.bf16.msra.mxu0 %v510_v2  ;;  %v497_v13 = vld [vmem:[#allocation8 + $0x8] sm:$0xff]  ;;  %v496_v15 = vld [vmem:[#allocation8] sm:$0xff]  ;;  %v102_v16 = vld [vmem:[#allocation6] sm:$0xff] }
  0x1d   :  { %249 = vmatpush.bf16.msra.mxu1 %v502_v3  ;;  %v106_v17 = vpack.c.bf16 %v102_v16, %v102_v16  ;;  %v104_v18 = vld [vmem:[#allocation3] sm:$0xf]  ;;  %v519_v19 = vld [vmem:[#allocation11 + $0x38] sm:$0xff]  ;;  %v517_v21 = vld [vmem:[#allocation11 + $0x28] sm:$0xff] }
  0x1e   :  { %346 = vmatpush.bf16.msra.mxu2 %v519_v19  ;;  %v518_v20 = vld [vmem:[#allocation11 + $0x30] sm:$0xff]  ;;  %v516_v22 = vld [vmem:[#allocation11 + $0x20] sm:$0xff]  ;;  %v515_v23 = vld [vmem:[#allocation11 + $0x18] sm:$0xff] }
  0x1f   :  { %v514_v24 = vld [vmem:[#allocation11 + $0x10] sm:$0xff]  ;;  %v513_v25 = vld [vmem:[#allocation11 + $0x8] sm:$0xff]  ;;  %v512_v26 = vld [vmem:[#allocation11] sm:$0xff] }
  0x20   :  { %189 = vmatpush.bf16.msra.mxu0 %v509_v4 }
  0x21   :  { %250 = vmatpush.bf16.msra.mxu1 %v501_v5 }
  0x22   :  { %347 = vmatpush.bf16.msra.mxu2 %v518_v20 }
  0x24   :  { %190 = vmatpush.bf16.msra.mxu0 %v508_v6 }
  0x25   :  { %251 = vmatpush.bf16.msra.mxu1 %v500_v7 }
  0x26   :  { %348 = vmatpush.bf16.msra.mxu2 %v517_v21 }
  0x28   :  { %191 = vmatpush.bf16.msra.mxu0 %v507_v8 }
  0x29   :  { %252 = vmatpush.bf16.msra.mxu1 %v499_v9 }
  0x2a   :  { %349 = vmatpush.bf16.msra.mxu2 %v516_v22 }
  0x2c   :  { %192 = vmatpush.bf16.msra.mxu0 %v506_v10 }
  0x2d   :  { %253 = vmatpush.bf16.msra.mxu1 %v498_v11 }
  0x2e   :  { %350 = vmatpush.bf16.msra.mxu2 %v515_v23 }
  0x30   :  { %193 = vmatpush.bf16.msra.mxu0 %v505_v12 }
  0x31   :  { %254 = vmatpush.bf16.msra.mxu1 %v497_v13 }
  0x32   :  { %351 = vmatpush.bf16.msra.mxu2 %v514_v24 }
  0x34   :  { %194 = vmatpush.bf16.msra.mxu0 %v504_v14 }
  0x35   :  { %255 = vmatpush.bf16.msra.mxu1 %v496_v15 }
  0x36   :  { %352 = vmatpush.bf16.msra.mxu2 %v513_v25 }
  0x37   :  { %195 = vmatmul.bf16.vlgmr.msra.gmra.mxu0 %v106_v17 }
  0x38   :  { %256 = vmatmul.bf16.vlgmr.msra.gmra.mxu1 %v104_v18 }
  0x3a   :  { %353 = vmatpush.bf16.msra.mxu2 %v512_v26 }
  0xb4   :  { %v196_v27 = vpop.f32.mrf.mxu0 }
  0xb5   :  { %v257_v28 = vpop.f32.mrf.mxu1 }
  0xb6   :  { %v258_v29 = vadd.f32 %v257_v28, %v196_v27 }
  0xb8   :  { %v463_v30 = vmul.f32 -1.442695, %v258_v29 }
  0xba   :  { %529 = vpow2.f32 %v463_v30 }
  0xbc   :  { %v198_v31 = vpop.f32.mrf.mxu0 }
  0xbd   :  { %v259_v32 = vpop.f32.mrf.mxu1 }
  0xc0   :  { %v530_v33 = vpop.eup %529 }
  0xc1   :  { %v264_v34 = vadd.f32 1.0, %v530_v33 }
  0xc3   :  { %531 = vrcp.f32 %v264_v34  ;;  %v276_v38 = vand.u32 2147483648, %v264_v34  ;;  %v274_v40 = vand.u32 2147483647, %v264_v34  ;;  %vm270_vm1 = vweird.f32 %v264_v34 }
  0xc5   :  { %v277_v42 = vor.u32 1.1754944e-38, %v276_v38  ;;  %vm275_vm3 = vcmp.eq.f32.partialorder %v274_v40, 8.507059e+37 }
  0xc9   :  { %v532_v35 = vpop.eup %531 }
  0xca   :  { %v266_v36 = vmul.f32 %v532_v35, %v264_v34  ;;  %vm271_vm0 = vweird.f32 %v532_v35 }
  0xcb   :  { %vm272_vm2 = vmor %vm270_vm1, %vm271_vm0 }
  0xcc   :  { %v267_v37 = vsub.f32 1.0, %v266_v36 }
  0xce   :  { %v268_v39 = vmul.f32 %v532_v35, %v267_v37 }
  0xd0   :  { %v269_v41 = vadd.f32 %v532_v35, %v268_v39 }
  0xd2   :  { %v273_v43 = vsel %vm272_vm2, %v532_v35, %v269_v41 }
  0xd3   :  { %v278_v44 = vsel %vm275_vm3, %v277_v42, %v273_v43 }
  0xd4   :  { %v281_v45 = vpack.c.bf16 %v278_v44, %v278_v44  ;;  %363 = vst [vmem:[#allocation13] sm:$0xff] %v278_v44 }
  0xd5   :  { %385 = dma.vmem_to_hbm [thread:$0]  %s381_s4, 128, %s383_s23, [#allocation14]  }
  0xd6   :  { %354 = vmatmul.bf16.vlgmr.msra.gmra.mxu2 %v281_v45 }
 0x159   :  { %v355_v46 = vpop.f32.mrf.mxu2 }
 0x15a   :  { %359 = vst [vmem:[#allocation12] sm:$0xff] %v355_v46 }
 0x15b   :  { %374 = dma.vmem_to_hbm [thread:$0]  %s370_s25, 128, %s372_s28, [#allocation5]  }
 0x161   :  { %v357_v47 = vpop.f32.mrf.mxu2 }
 0x162   :  { %707 = dma.done.wait [#allocation5], 128  }
 0x163   :  { %708 = vsyncadd [#allocation5], 4294967168 }
 0x164   :  { %709 = dma.done.wait [#allocation14], 128  }
 0x165   :  { %710 = vsyncadd [#allocation14], 4294967168 }
 0x166   :  { %394 = vsyncpa [#allocation4], 1 }
 0x167   :  { %395 = vsyncpa [#allocation7], 1 }
 0x168   :  { %396 = vsyncpa [#allocation10], 1 }
 0x169   :  { %397 = vsyncpa [#allocation5], 1 }
 0x16a   :  { %398 = vsyncpa [#allocation14], 1 }

</bundles_post_ra>
